<compile_context>
chip_gen: v6e
topology: v6e:2x2x1
jax: 0.10.0
libtpu: 0.0.40
codegen_flags: <defaults>
</compile_context>

<pallas_src>
import jax
import jax.numpy as jnp
from jax.experimental import pallas as pl
from jax.experimental.pallas import tpu as pltpu

# Tree.num_sem is an external constant in the reference code; fix it here.
NUM_SEM = 8


def node_diff_feature_extractor(x, params):
    """x: (B, 4*feature_size + NUM_SEM) float32. Returns (B, feature_size)."""
    w1, b1, w2, b2, ws, bs = (params["w1"], params["b1"], params["w2"],
                              params["b2"], params["ws"], params["bs"])
    B, Din = x.shape
    H = w1.shape[1]
    F = w2.shape[1]

    # Pack the two x-consuming linears into one matmul: (Din, H) | (Din, F).
    w1s = jnp.concatenate([w1, ws], axis=1)      # (Din, H + F)
    b1s = jnp.concatenate([b1, bs], axis=1)      # (1,   H + F)

    # Batch tile: full B if it fits one block, else 1024-row tiles (divisible
    # by 8; ragged tail handled by Pallas masking). Fits scoped VMEM on
    # v5e/v6e/v7x with double buffering.
    TB = B if B <= 1024 else 1024
    grid = (pl.cdiv(B, TB),)

    def kernel(x_ref, w1s_ref, b1s_ref, w2_ref, b2_ref, o_ref):
        xb = x_ref[...]                                            # (TB, Din)
        # Fused mlp1 + skip on the MXU, single result tile.
        y = jnp.dot(xb, w1s_ref[...], preferred_element_type=jnp.float32)
        y = y + b1s_ref[...]                                       # (TB, H+F)
        h = jnp.maximum(y[:, :H], 0.0)                             # relu(mlp1)
        skip = y[:, H:]                                            # skip(x)
        out = jnp.dot(h, w2_ref[...], preferred_element_type=jnp.float32)
        out = out + b2_ref[...] + skip
        o_ref[...] = jnp.maximum(out, 0.0).astype(o_ref.dtype)

    cost = pl.CostEstimate(
        flops=2 * B * (Din * (H + F) + H * F),
        transcendentals=0,
        bytes_accessed=4 * (B * Din + B * F
                            + Din * (H + F) + (H + F) + H * F + F),
    )

    return pl.pallas_call(
        kernel,
        out_shape=jax.ShapeDtypeStruct((B, F), x.dtype),
        grid_spec=pltpu.PrefetchScalarGridSpec(
            num_scalar_prefetch=0,
            grid=grid,
            in_specs=[
                pl.BlockSpec((TB, Din), lambda i: (i, 0)),     # x  (streamed)
                pl.BlockSpec((Din, H + F), lambda i: (0, 0)),  # w1|ws resident
                pl.BlockSpec((1, H + F), lambda i: (0, 0)),    # b1|bs resident
                pl.BlockSpec((H, F), lambda i: (0, 0)),        # w2    resident
                pl.BlockSpec((1, F), lambda i: (0, 0)),        # b2    resident
            ],
            out_specs=pl.BlockSpec((TB, F), lambda i: (i, 0)),
        ),
        compiler_params=pltpu.CompilerParams(
            dimension_semantics=("parallel",),   # megacore sharding on v7x
        ),
        cost_estimate=cost,
    )(x, w1s, b1s, w2, b2)


def init_params(feature_size, hidden_size, key):
    """Deterministic parameter init (uniform, PyTorch-Linear-like scale)."""
    in_dim = 4 * feature_size + NUM_SEM
    ks = jax.random.split(key, 6)

    def lin(kw, kb, fan_in, fan_out):
        bound = 1.0 / jnp.sqrt(fan_in)
        # store weight as (fan_in, fan_out) = W^T relative to torch nn.Linear
        w = jax.random.uniform(kw, (fan_in, fan_out), jnp.float32,
                               -bound, bound)
        b = jax.random.uniform(kb, (1, fan_out), jnp.float32, -bound, bound)
        return w, b

    w1, b1 = lin(ks[0], ks[1], in_dim, hidden_size)
    w2, b2 = lin(ks[2], ks[3], hidden_size, feature_size)
    ws, bs = lin(ks[4], ks[5], in_dim, feature_size)
    return {"w1": w1, "b1": b1, "w2": w2, "b2": b2, "ws": ws, "bs": bs}


def reference(x, p):
    h = jax.nn.relu(x @ p["w1"] + p["b1"])
    return jax.nn.relu(x @ p["ws"] + p["bs"] + h @ p["w2"] + p["b2"])


if __name__ == "__main__":
    feature_size = 16
    hidden_size = 32
    batch = 8
    in_dim = 4 * feature_size + NUM_SEM  # 72

    key = jax.random.PRNGKey(0)
    kx, kp = jax.random.split(key)
    x = jax.random.normal(kx, (batch, in_dim), dtype=jnp.float32)
    params = init_params(feature_size, hidden_size, kp)

    out = node_diff_feature_extractor(x, params)
    out = jax.block_until_ready(out)

    ref = reference(x, params)
    assert out.shape == (batch, feature_size)
    assert jnp.allclose(out, ref, atol=1e-5, rtol=1e-5), "mismatch vs reference"

    # Second shape: exercises the batch-tiled path (multiple grid steps,
    # ragged last tile) while staying modest in size.
    batch2 = 2056
    x2 = jax.random.normal(jax.random.PRNGKey(1), (batch2, in_dim),
                           dtype=jnp.float32)
    out2 = jax.block_until_ready(node_diff_feature_extractor(x2, params))
    assert out2.shape == (batch2, feature_size)
    assert jnp.allclose(out2, reference(x2, params), atol=1e-4, rtol=1e-4), \
        "mismatch vs reference (tiled path)"

    print("KERNEL_OK")
</pallas_src>

<mosaic_0001>
module attributes {stable_mosaic.version = 11 : i64} {
  func.func @kernel(%arg0: i32, %arg1: memref<8x72xf32, #tpu.memory_space<vmem>>, %arg2: memref<72x48xf32, #tpu.memory_space<vmem>>, %arg3: memref<1x48xf32, #tpu.memory_space<vmem>>, %arg4: memref<32x16xf32, #tpu.memory_space<vmem>>, %arg5: memref<1x16xf32, #tpu.memory_space<vmem>>, %arg6: memref<8x16xf32, #tpu.memory_space<vmem>>) attributes {dimension_semantics = [#tpu.dimension_semantics<parallel>], iteration_bounds = array<i64: 1>, scalar_prefetch = 0 : i64, scratch_operands = 0 : i64, tpu.core_type = #tpu.core_type<tc>, window_params = [{transform_indices = @transform_0, window_bounds = array<i64: 8, 72>}, {pipeline_mode = #tpu.pipeline_mode<synchronous>, transform_indices = @transform_1, window_bounds = array<i64: 72, 48>}, {pipeline_mode = #tpu.pipeline_mode<synchronous>, transform_indices = @transform_2, window_bounds = array<i64: 1, 48>}, {pipeline_mode = #tpu.pipeline_mode<synchronous>, transform_indices = @transform_3, window_bounds = array<i64: 32, 16>}, {pipeline_mode = #tpu.pipeline_mode<synchronous>, transform_indices = @transform_4, window_bounds = array<i64: 1, 16>}, {transform_indices = @transform_5, window_bounds = array<i64: 8, 16>}]} {
    %c0 = arith.constant 0 : index
    %c0_0 = arith.constant 0 : index
    %0 = vector.load %arg1[%c0, %c0_0] : memref<8x72xf32, #tpu.memory_space<vmem>>, vector<8x72xf32>
    %c0_1 = arith.constant 0 : index
    %c0_2 = arith.constant 0 : index
    %1 = vector.load %arg2[%c0_1, %c0_2] : memref<72x48xf32, #tpu.memory_space<vmem>>, vector<72x48xf32>
    %cst = arith.constant dense<0.000000e+00> : vector<8x48xf32>
    %2 = tpu.matmul %0, %1, %cst {dimension_numbers = #tpu.dot_dimension_numbers<[1], [0], [0], [1], [0, 0, 1, 1], [], []>} : vector<8x72xf32>, vector<72x48xf32>, vector<8x48xf32> -> vector<8x48xf32>
    %c0_3 = arith.constant 0 : index
    %c0_4 = arith.constant 0 : index
    %3 = vector.load %arg3[%c0_3, %c0_4] : memref<1x48xf32, #tpu.memory_space<vmem>>, vector<1x48xf32>
    %4 = vector.broadcast %3 : vector<1x48xf32> to vector<8x48xf32>
    %5 = arith.addf %2, %4 : vector<8x48xf32>
    %6 = vector.extract_strided_slice %5 {offsets = [0, 0], sizes = [8, 32], strides = [1, 1]} : vector<8x48xf32> to vector<8x32xf32>
    %cst_5 = arith.constant 0.000000e+00 : f32
    %7 = vector.broadcast %cst_5 : f32 to vector<8x32xf32>
    %8 = arith.maximumf %6, %7 : vector<8x32xf32>
    %9 = vector.extract_strided_slice %5 {offsets = [0, 32], sizes = [8, 16], strides = [1, 1]} : vector<8x48xf32> to vector<8x16xf32>
    %c0_6 = arith.constant 0 : index
    %c0_7 = arith.constant 0 : index
    %10 = vector.load %arg4[%c0_6, %c0_7] : memref<32x16xf32, #tpu.memory_space<vmem>>, vector<32x16xf32>
    %cst_8 = arith.constant dense<0.000000e+00> : vector<8x16xf32>
    %11 = tpu.matmul %8, %10, %cst_8 {dimension_numbers = #tpu.dot_dimension_numbers<[1], [0], [0], [1], [0, 0, 1, 1], [], []>} : vector<8x32xf32>, vector<32x16xf32>, vector<8x16xf32> -> vector<8x16xf32>
    %c0_9 = arith.constant 0 : index
    %c0_10 = arith.constant 0 : index
    %12 = vector.load %arg5[%c0_9, %c0_10] : memref<1x16xf32, #tpu.memory_space<vmem>>, vector<1x16xf32>
    %13 = vector.broadcast %12 : vector<1x16xf32> to vector<8x16xf32>
    %14 = arith.addf %11, %13 : vector<8x16xf32>
    %15 = arith.addf %14, %9 : vector<8x16xf32>
    %cst_11 = arith.constant 0.000000e+00 : f32
    %16 = vector.broadcast %cst_11 : f32 to vector<8x16xf32>
    %17 = arith.maximumf %15, %16 : vector<8x16xf32>
    %c0_12 = arith.constant 0 : index
    %c0_13 = arith.constant 0 : index
    %18 = vector.load %arg6[%c0_12, %c0_13] : memref<8x16xf32, #tpu.memory_space<vmem>>, vector<8x16xf32>
    tpu.vector_store %arg6[%c0_12, %c0_13], %17 {strides = array<i32>} : memref<8x16xf32, #tpu.memory_space<vmem>>, vector<8x16xf32>,
    return
  }
  func.func @transform_0(%arg0: i32) -> (i32, i32) {
    %c0_i32 = arith.constant 0 : i32
    %c0_i32_0 = arith.constant 0 : i32
    return %arg0, %c0_i32 : i32, i32
  }
  func.func @transform_1(%arg0: i32) -> (i32, i32) {
    %c0_i32 = arith.constant 0 : i32
    %c0_i32_0 = arith.constant 0 : i32
    %c0_i32_1 = arith.constant 0 : i32
    return %c0_i32, %c0_i32_0 : i32, i32
  }
  func.func @transform_2(%arg0: i32) -> (i32, i32) {
    %c0_i32 = arith.constant 0 : i32
    %c0_i32_0 = arith.constant 0 : i32
    %c0_i32_1 = arith.constant 0 : i32
    return %c0_i32, %c0_i32_0 : i32, i32
  }
  func.func @transform_3(%arg0: i32) -> (i32, i32) {
    %c0_i32 = arith.constant 0 : i32
    %c0_i32_0 = arith.constant 0 : i32
    %c0_i32_1 = arith.constant 0 : i32
    return %c0_i32, %c0_i32_0 : i32, i32
  }
  func.func @transform_4(%arg0: i32) -> (i32, i32) {
    %c0_i32 = arith.constant 0 : i32
    %c0_i32_0 = arith.constant 0 : i32
    %c0_i32_1 = arith.constant 0 : i32
    return %c0_i32, %c0_i32_0 : i32, i32
  }
  func.func @transform_5(%arg0: i32) -> (i32, i32) {
    %c0_i32 = arith.constant 0 : i32
    %c0_i32_0 = arith.constant 0 : i32
    return %arg0, %c0_i32 : i32, i32
  }
}

</mosaic_0001>

<bundles_post_ra>
// kernel: tpu_custom_call.1
= control target key start
LH: loop header
LB: loop body
LE: loop exit
PB: predicated region body
PF: predicated region fallthrough
CT: control target
= control target key end

     0   :  { %v297_v1 = vmov 0.0   ;;  %vm298_vm0 = vmmov 0   ;;  %s382_s0 = inlined_call_operand.vmem [shape: f32[8,72], index: 0, kind: input, shape index: {}]   ;;  %s383_s1 = inlined_call_operand.vmem [shape: f32[72,48], index: 1, kind: input, shape index: {}]   ;;  %s384_s2 = inlined_call_operand.vmem [shape: f32[1,48], index: 2, kind: input, shape index: {}]   ;;  %s385_s3 = inlined_call_operand.vmem [shape: f32[32,16], index: 3, kind: input, shape index: {}]   ;;  %s386_s4 = inlined_call_operand.vmem [shape: f32[1,16], index: 4, kind: input, shape index: {}]   ;;  %s387_s5 = inlined_call_operand.hbm [shape: f32[8,16], index: 5, kind: output, shape index: {}]  }
   0x1   :  { %v30_v0 = vld [vmem:[%s383_s1 + $0x40] sm:$0xff]  ;;  %239 = vmatprep.subr.mxu0 %v297_v1  ;;  %v29_v2 = vld [vmem:[%s383_s1 + $0x38] sm:$0xff]  ;;  %257 = vmatprep.mubr.msk.f32.mxu0 %vm298_vm0, %v297_v1  ;;  %v28_v3 = vld [vmem:[%s383_s1 + $0x30] sm:$0xff] }
   0x2   :  { %240 = vmatpush3.msra.mxu0 %v30_v0  ;;  %260 = vmatprep.subr.mxu1 %v297_v1  ;;  %v116_v4 = vld [vmem:[%s385_s3 + $0x18] sm:$0xff] }
   0x3   :  { %241 = vmatprep.subr.mxu0 %v297_v1  ;;  %268 = vmatprep.mubr.msk.f32.mxu1 %vm298_vm0, %v297_v1 }
   0x4   :  { %242 = vmatpush3.msra.mxu0 %v29_v2  ;;  %261 = vmatpush3.msra.mxu1 %v116_v4 }
   0x5   :  { %10 = vsyncpa [#allocation3], 0  ;;  %243 = vmatprep.subr.mxu0 %v297_v1  ;;  %v27_v5 = vld [vmem:[%s383_s1 + $0x28] sm:$0xff]  ;;  %262 = vmatprep.subr.mxu1 %v297_v1  ;;  %v26_v6 = vld [vmem:[%s383_s1 + $0x20] sm:$0xff]  ;;  %vm38_vm1 = vcmask 588800   ;;  %vm124_vm2 = vcmask 261120  }
   0x6   :  { %244 = vmatpush3.msra.mxu0 %v28_v3  ;;  %v25_v7 = vld [vmem:[%s383_s1 + $0x18] sm:$0xff]  ;;  %v24_v8 = vld [vmem:[%s383_s1 + $0x10] sm:$0xff]  ;;  %v23_v9 = vld [vmem:[%s383_s1 + $0x8] sm:$0xff]  ;;  %s299_s21 = smov 96   ;;  %vm204_vm3 = vcmask 130048  }
   0x7   :  { %245 = vmatprep.subr.mxu0 %v297_v1  ;;  %v22_v10 = vld [vmem:[%s383_s1] sm:$0xff]  ;;  %v115_v12 = vld [vmem:[%s385_s3 + $0x10] sm:$0xff]  ;;  %v114_v13 = vld [vmem:[%s385_s3 + $0x8] sm:$0xff] }
   0x8   :  { %246 = vmatpush3.msra.mxu0 %v27_v5  ;;  %v21_v11 = vld [vmem:[%s382_s0] sm:$0xff]  ;;  %263 = vmatpush3.msra.mxu1 %v115_v12 }
   0x9   :  { %247 = vmatprep.subr.mxu0 %v297_v1  ;;  %264 = vmatprep.subr.mxu1 %v297_v1  ;;  %v113_v14 = vld [vmem:[%s385_s3] sm:$0xff]  ;;  %s300_s3 = smov [#allocation2]  }
   0xa   :  { %248 = vmatpush3.msra.mxu0 %v26_v6  ;;  %265 = vmatpush3.msra.mxu1 %v114_v13  ;;  %v220_v15 = vld [vmem:[%s384_s2] ss:$0 sm:$0xff]  ;;  %s212_s24 = sshll.u32 %s300_s3, 4  ;;  %s213_s24 = int_to_ptr.vmem [resolvable:$true] %s212_s24 }
   0xb   :  { %249 = vmatprep.subr.mxu0 %v297_v1  ;;  %266 = vmatprep.subr.mxu1 %v297_v1  ;;  %v222_v20 = vld [vmem:[%s386_s4] ss:$0 sm:$0xff]  ;;  %s275_s2 = scalar_lea.vmem %s213_s24, 128  ;;  %p280_p1 = scmp.lt.s32.totalorder %s213_s24, %s213_s24 }
   0xc   :  { %250 = vmatpush3.msra.mxu0 %v25_v7  ;;  %267 = vmatpush3.msra.mxu1 %v113_v14  ;;  %p276_p0 = scmp.ne.s32.totalorder %s213_s24, %s275_s2  ;;  %p281_p2 = scmp.lt.s32.totalorder %s275_s2, %s275_s2 }
   0xd   :  { %251 = vmatprep.subr.mxu0 %v297_v1 }
   0xe   :  { %252 = vmatpush3.msra.mxu0 %v24_v8  ;;  %p282_p3 = por %p281_p2, %p280_p1 }
   0xf   :  { %253 = vmatprep.subr.mxu0 %v297_v1 }
  0x10   :  { %254 = vmatpush3.msra.mxu0 %v23_v9  ;;  %p283_p4 = pnand %p282_p3, %p276_p0 }
  0x11   :  { %255 = vmatprep.subr.mxu0 %v297_v1 }
  0x12   :  { %256 = vmatpush3.msra.mxu0 %v22_v10 }
  0x13   :  { %258 = vmatmul.mubr.msk.f32.vlgmr.msra.gmra.mxu0 %vm38_vm1, %v21_v11 }
  0xd3   :  { %v108_v16 = vpop.f32.mrf.mxu0 }
  0xd4   :  { %v109_v17 = vadd.f32 %v220_v15, %v108_v16 }
  0xd5   :  { %v259_v18 = vpop.f32.mrf.mxu0 }
  0xd6   :  { %v112_v19 = vmax.f32 %v109_v17, 0.0  ;;  %199 = vrot.lane.b32.xlu0 %v109_v17, %s299_s21 }
  0xd8   :  { %269 = vmatmul.mubr.msk.f32.vlgmr.msra.gmra.mxu1 %vm124_vm2, %v112_v19 }
 0x148   :  { %v200_v23 = vpop.permute.xlu0 %199 }
 0x198   :  { %v194_v21 = vpop.f32.mrf.mxu1 }
 0x199   :  { %v195_v22 = vadd.f32 %v222_v20, %v194_v21 }
 0x19a   :  { %v270_v24 = vpop.f32.mrf.mxu1 }
 0x19b   :  { %v202_v25 = vadd.f32 %v200_v23, %v195_v22 }
 0x19d   :  { %v203_v26 = vmax.f32 %v202_v25, 0.0 }
 0x19f   :  { %205 = vst.msk [vmem:[#allocation2] sm:$0xff] %vm204_vm3, %v203_v26 }
 0x1a0   :  { %286 = shalt.err (!%p283_p4)
}
 0x1a1   :  { %215 = dma.vmem_to_hbm [thread:$0]  %s213_s24, 128, %s387_s5, [#allocation3]  }
 0x1a2   :  { %295 = dma.done.wait [#allocation3], 128  }
 0x1a3   :  { %296 = vsyncadd [#allocation3], 4294967168 }
 0x1a4   :  { %219 = vsyncpa [#allocation3], 1 }

</bundles_post_ra>
